<compile_context>
chip_gen: v6e
topology: v6e:2x2x1
jax: 0.10.0
libtpu: 0.0.40
codegen_flags: <defaults>
</compile_context>

<pallas_src>
import functools

import numpy as np
import jax
import jax.numpy as jnp
from jax.experimental import pallas as pl
from jax.experimental.pallas import tpu as pltpu


def _round_up(x, m):
    return (x + m - 1) // m * m


def pmd_kernel(tile_ids_ref, md_ref, times_ref, diag_ref, med_ref,
               new_md_ref, rec_ref):
    del tile_ids_ref  # only used by the index_maps
    i = pl.program_id(1)  # trailing, sequential ("arbitrary") D-tile axis

    mask = (diag_ref[...] == 1.0).astype(jnp.float32)            # (td, 1)

    # training-mode state update of origin_MD (diag_times is updated in wrapper)
    new_md = md_ref[...] + mask * med_ref[...]                    # (td, tm)
    new_md_ref[...] = new_md

    times = times_ref[...]                                        # post-update counts
    # exact reciprocal (do NOT use approx EUP reciprocal: counts are exact ints)
    inv = jnp.where(times != 0.0, 1.0 / times, 0.0)               # (td, 1)
    w = mask * inv                                                # (td, 1)

    # partial med_rec: sum over active diag rows of this D-tile
    partial = jnp.sum(w * new_md, axis=0, keepdims=True)          # (1, tm)

    @pl.when(i == 0)
    def _():
        rec_ref[...] = partial                                    # init folded in

    @pl.when(i != 0)
    def _():
        rec_ref[...] += partial

    @pl.when(i == pl.num_programs(1) - 1)
    def _():
        rec_ref[...] = jnp.clip(rec_ref[...], 0.0, 1.0)


def pmd_geometry(D, M, *, td=None, m_tiles=None,
                 vmem_budget_bytes=12 * 1024 * 1024):
    """Storage / tiling geometry (computed once; state kept padded to it)."""
    M128 = _round_up(M, 128)

    if m_tiles is None:
        m_tiles = 1
        if M128 >= 256:
            kind = ""
            try:
                kind = jax.devices()[0].device_kind.lower()
            except Exception:
                pass
            if ("v7" in kind) or ("v4" in kind):     # chips with 2 TensorCores
                m_tiles = max(2, -(-M128 // 4096))
    m_tiles = max(1, min(m_tiles, M128 // 128))

    tm = _round_up(-(-M128 // m_tiles), 128)
    M_pad = tm * m_tiles

    # VMEM per MD row: double-buffered (td,tm) f32 input + output tile = 16*tm B,
    # plus two lane-padded (td,1) side inputs (times, diag), double-buffered
    # -> 2 * 2 * 512 B per row.
    bytes_per_row = 16 * tm + 2 * 2 * 512
    if td is None:
        max_rows = max(8, vmem_budget_bytes // bytes_per_row)
        td = _round_up(D, 8) if D <= max_rows else (max_rows // 8) * 8
    td = max(8, _round_up(td, 8))

    D_pad = _round_up(D, td)
    n_tiles = D_pad // td
    D_state = D_pad + td          # one reserved all-zero dummy tile at the end
    return dict(td=td, tm=tm, m_tiles=m_tiles, M_pad=M_pad,
                D_pad=D_pad, D_state=D_state, n_tiles=n_tiles)


def pmd_init_state(origin_md, diag_times, geom):
    """Pad module state once into the kernel storage layout (kept padded)."""
    D, M = origin_md.shape
    md_p = jnp.zeros((geom["D_state"], geom["M_pad"]), jnp.float32)
    md_p = md_p.at[:D, :M].set(origin_md.astype(jnp.float32))
    times_p = jnp.zeros((geom["D_state"], 1), jnp.float32)
    times_p = times_p.at[:D, :].set(diag_times.astype(jnp.float32).reshape(D, 1))
    return md_p, times_p


def make_pmd_forward(D, M, geom, *, vmem_limit_bytes=None):
    td, tm = geom["td"], geom["tm"]
    m_tiles, n_tiles = geom["m_tiles"], geom["n_tiles"]
    D_pad, D_state, M_pad = geom["D_pad"], geom["D_state"], geom["M_pad"]

    if vmem_limit_bytes is None:
        try:
            cap = pltpu.get_tpu_info().vmem_capacity_bytes
        except Exception:
            cap = 64 * 1024 * 1024
        vmem_limit_bytes = min(32 * 1024 * 1024, cap // 2)

    grid_spec = pltpu.PrefetchScalarGridSpec(
        num_scalar_prefetch=1,
        grid=(m_tiles, n_tiles),          # M axis parallel, D axis = reduction (last)
        in_specs=[
            pl.BlockSpec((td, tm), lambda j, i, t: (t[i], j)),   # origin_MD tile
            pl.BlockSpec((td, 1), lambda j, i, t: (t[i], 0)),    # updated diag_times
            pl.BlockSpec((td, 1), lambda j, i, t: (t[i], 0)),    # mhot_diag
            pl.BlockSpec((1, tm), lambda j, i, t: (0, j)),       # mhot_med (bcast over D)
        ],
        out_specs=[
            pl.BlockSpec((td, tm), lambda j, i, t: (t[i], j)),   # new origin_MD (aliased)
            pl.BlockSpec((1, tm), lambda j, i, t: (0, j)),       # med_rec accumulator
        ],
    )

    call = pl.pallas_call(
        pmd_kernel,
        grid_spec=grid_spec,
        out_shape=[
            jax.ShapeDtypeStruct((D_state, M_pad), jnp.float32),
            jax.ShapeDtypeStruct((1, M_pad), jnp.float32),
        ],
        # arg 0 is the scalar-prefetch tile index list; arg 1 is origin_MD.
        input_output_aliases={1: 0},
        compiler_params=pltpu.CompilerParams(
            dimension_semantics=("parallel", "arbitrary"),
            vmem_limit_bytes=vmem_limit_bytes),
    )

    @functools.partial(jax.jit, donate_argnums=(0, 1))
    def forward(origin_md_p, diag_times_p, mhot_diag, mhot_med):
        # Per-call inputs padded to storage layout (O(D)/O(M), negligible).
        diag_p = jnp.zeros((D_state, 1), jnp.float32).at[:D, :].set(
            mhot_diag.astype(jnp.float32).reshape(D, 1))
        med_p = jnp.zeros((1, M_pad), jnp.float32).at[:, :M].set(
            mhot_med.astype(jnp.float32).reshape(1, M))

        # diag_times state update as a fused XLA add (kept out of the kernel).
        new_times_p = diag_times_p + diag_p

        # Active-tile compaction: active D-tiles first, remaining grid steps
        # mapped to the reserved all-zero dummy tile (index n_tiles).  Never a
        # real tile index (would double-accumulate rec).  Unvisited MD tiles
        # are preserved through the output alias.
        active = jnp.any(diag_p[:D_pad].reshape(n_tiles, td) == 1.0, axis=1)
        order = jnp.argsort(jnp.logical_not(active).astype(jnp.int32))
        tile_ids = jnp.where(active[order], order, n_tiles).astype(jnp.int32)

        new_md_p, rec_p = call(tile_ids, origin_md_p, new_times_p, diag_p, med_p)
        return new_md_p, new_times_p, rec_p[:, :M]

    return forward


def pmd_reference(origin_md, diag_times, mhot_diag, mhot_med):
    mask = (mhot_diag == 1.0).astype(np.float32)
    new_md = origin_md + mask * mhot_med
    new_times = diag_times + mhot_diag
    inv = np.zeros_like(new_times)
    nz = new_times != 0.0
    inv[nz] = 1.0 / new_times[nz]
    rec = np.clip((mask * inv * new_md).sum(axis=0, keepdims=True), 0.0, 1.0)
    return new_md, new_times, rec


if __name__ == "__main__":
    # TODO(synk): the module's nn.Linear(16*16, 512) `dense` is dead code in
    # forward and is intentionally not instantiated here.
    # TODO(synk): only the training-mode forward (with state update) is
    # implemented; eval mode would skip the += updates.
    D, M = 256, 128       # diag vocab size, med vocab size (small synthetic)

    # Force several D tiles (td=64) so the sparse scalar-prefetch path and the
    # alias-preservation of unvisited tiles are actually exercised.
    geom = pmd_geometry(D, M, td=64)

    key = jax.random.PRNGKey(0)
    k0, k1, k3 = jax.random.split(key, 3)

    # module state (deterministic synthetic init)
    origin_md = jax.random.uniform(k0, (D, M), jnp.float32, 0.0, 3.0)
    diag_times = jax.random.randint(k1, (D, 1), 0, 5).astype(jnp.float32)

    # forward inputs: sparse multi-hot diagnosis (tiles 1 and 3 active for td=64,
    # tiles 0 and 2 untouched) and a multi-hot medication vector.
    mhot_diag = jnp.zeros((D, 1), jnp.float32).at[
        jnp.array([70, 75, 200, 210, 255]), 0].set(1.0)
    mhot_med = (jax.random.uniform(k3, (1, M)) < 0.3).astype(jnp.float32)

    # Host copies for the reference: the state buffers are donated to the kernel.
    ref_in = tuple(np.asarray(a) for a in (origin_md, diag_times, mhot_diag, mhot_med))

    md_p, times_p = pmd_init_state(origin_md, diag_times, geom)
    fwd = make_pmd_forward(D, M, geom)
    new_md_p, new_times_p, med_rec = fwd(md_p, times_p, mhot_diag, mhot_med)
    jax.block_until_ready(med_rec)

    r_md, r_times, r_rec = pmd_reference(*ref_in)
    np.testing.assert_allclose(np.asarray(new_md_p)[:D, :M], r_md, rtol=1e-5, atol=1e-5)
    np.testing.assert_allclose(np.asarray(new_times_p)[:D, :], r_times, rtol=1e-5, atol=1e-5)
    np.testing.assert_allclose(np.asarray(med_rec), r_rec, rtol=1e-5, atol=1e-5)

    print("KERNEL_OK")
</pallas_src>

<mosaic_0001>
module attributes {stable_mosaic.version = 11 : i64} {
  func.func @pmd_kernel(%arg0: i32, %arg1: i32, %arg2: memref<4xi32, #tpu.memory_space<smem>>, %arg3: memref<64x128xf32, #tpu.memory_space<vmem>>, %arg4: memref<64x1xf32, #tpu.memory_space<vmem>>, %arg5: memref<64x1xf32, #tpu.memory_space<vmem>>, %arg6: memref<1x128xf32, #tpu.memory_space<vmem>>, %arg7: memref<64x128xf32, #tpu.memory_space<vmem>>, %arg8: memref<1x128xf32, #tpu.memory_space<vmem>>) attributes {dimension_semantics = [#tpu.dimension_semantics<parallel>, #tpu.dimension_semantics<arbitrary>], iteration_bounds = array<i64: 1, 4>, scalar_prefetch = 1 : i64, scratch_operands = 0 : i64, tpu.core_type = #tpu.core_type<tc>, window_params = [{transform_indices = @transform_0, window_bounds = array<i64: 64, 128>}, {transform_indices = @transform_1, window_bounds = array<i64: 64, 1>}, {transform_indices = @transform_2, window_bounds = array<i64: 64, 1>}, {transform_indices = @transform_3, window_bounds = array<i64: 1, 128>}, {transform_indices = @transform_4, window_bounds = array<i64: 64, 128>}, {transform_indices = @transform_5, window_bounds = array<i64: 1, 128>}]} {
    %c0 = arith.constant 0 : index
    %c0_0 = arith.constant 0 : index
    %0 = vector.load %arg5[%c0, %c0_0] : memref<64x1xf32, #tpu.memory_space<vmem>>, vector<64x1xf32>
    %cst = arith.constant 1.000000e+00 : f32
    %1 = vector.broadcast %cst : f32 to vector<64x1xf32>
    %2 = arith.cmpf oeq, %0, %1 : vector<64x1xf32>
    %3 = arith.extui %2 : vector<64x1xi1> to vector<64x1xi32>
    %4 = arith.sitofp %3 : vector<64x1xi32> to vector<64x1xf32>
    %c0_1 = arith.constant 0 : index
    %c0_2 = arith.constant 0 : index
    %5 = vector.load %arg3[%c0_1, %c0_2] : memref<64x128xf32, #tpu.memory_space<vmem>>, vector<64x128xf32>
    %c0_3 = arith.constant 0 : index
    %c0_4 = arith.constant 0 : index
    %6 = vector.load %arg6[%c0_3, %c0_4] : memref<1x128xf32, #tpu.memory_space<vmem>>, vector<1x128xf32>
    %7 = vector.broadcast %4 : vector<64x1xf32> to vector<64x128xf32>
    %8 = vector.broadcast %6 : vector<1x128xf32> to vector<64x128xf32>
    %9 = arith.mulf %7, %8 : vector<64x128xf32>
    %10 = arith.addf %5, %9 : vector<64x128xf32>
    %c0_5 = arith.constant 0 : index
    %c0_6 = arith.constant 0 : index
    %11 = vector.load %arg7[%c0_5, %c0_6] : memref<64x128xf32, #tpu.memory_space<vmem>>, vector<64x128xf32>
    tpu.vector_store %arg7[%c0_5, %c0_6], %10 {strides = array<i32>} : memref<64x128xf32, #tpu.memory_space<vmem>>, vector<64x128xf32>,
    %c0_7 = arith.constant 0 : index
    %c0_8 = arith.constant 0 : index
    %12 = vector.load %arg4[%c0_7, %c0_8] : memref<64x1xf32, #tpu.memory_space<vmem>>, vector<64x1xf32>
    %cst_9 = arith.constant 0.000000e+00 : f32
    %13 = vector.broadcast %cst_9 : f32 to vector<64x1xf32>
    %14 = arith.cmpf one, %12, %13 : vector<64x1xf32>
    %cst_10 = arith.constant 1.000000e+00 : f32
    %15 = vector.broadcast %cst_10 : f32 to vector<64x1xf32>
    %16 = arith.divf %15, %12 : vector<64x1xf32>
    %cst_11 = arith.constant 0.000000e+00 : f32
    %17 = vector.broadcast %cst_11 : f32 to vector<64x1xf32>
    %18 = arith.select %14, %16, %17 : vector<64x1xi1>, vector<64x1xf32>
    %19 = arith.mulf %4, %18 : vector<64x1xf32>
    %20 = vector.broadcast %19 : vector<64x1xf32> to vector<64x128xf32>
    %21 = arith.mulf %20, %10 : vector<64x128xf32>
    %cst_12 = arith.constant dense<0.000000e+00> : vector<128xf32>
    %22 = vector.multi_reduction <add>, %21, %cst_12 [0] : vector<64x128xf32> to vector<128xf32>
    %23 = vector.shape_cast %22 : vector<128xf32> to vector<1x128xf32>
    %c0_i32 = arith.constant 0 : i32
    %24 = arith.cmpi eq, %arg1, %c0_i32 : i32
    %25 = arith.extui %24 : i1 to i32
    %c0_i32_13 = arith.constant 0 : i32
    %26 = arith.cmpi ne, %25, %c0_i32_13 : i32
    scf.if %26 {
      %c0_17 = arith.constant 0 : index
      %c0_18 = arith.constant 0 : index
      %33 = vector.load %arg8[%c0_17, %c0_18] : memref<1x128xf32, #tpu.memory_space<vmem>>, vector<1x128xf32>
      tpu.vector_store %arg8[%c0_17, %c0_18], %23 {strides = array<i32>} : memref<1x128xf32, #tpu.memory_space<vmem>>, vector<1x128xf32>,
    } else {
    }
    %c0_i32_14 = arith.constant 0 : i32
    %27 = arith.cmpi ne, %arg1, %c0_i32_14 : i32
    %28 = arith.extui %27 : i1 to i32
    %c0_i32_15 = arith.constant 0 : i32
    %29 = arith.cmpi ne, %28, %c0_i32_15 : i32
    scf.if %29 {
      %c0_17 = arith.constant 0 : index
      %c0_18 = arith.constant 0 : index
      %33 = vector.load %arg8[%c0_17, %c0_18] : memref<1x128xf32, #tpu.memory_space<vmem>>, vector<1x128xf32>
      %34 = arith.addf %33, %23 : vector<1x128xf32>
      %c0_19 = arith.constant 0 : index
      %c0_20 = arith.constant 0 : index
      %35 = vector.load %arg8[%c0_19, %c0_20] : memref<1x128xf32, #tpu.memory_space<vmem>>, vector<1x128xf32>
      tpu.vector_store %arg8[%c0_19, %c0_20], %34 {strides = array<i32>} : memref<1x128xf32, #tpu.memory_space<vmem>>, vector<1x128xf32>,
    } else {
    }
    %c3_i32 = arith.constant 3 : i32
    %30 = arith.cmpi eq, %arg1, %c3_i32 : i32
    %31 = arith.extui %30 : i1 to i32
    %c0_i32_16 = arith.constant 0 : i32
    %32 = arith.cmpi ne, %31, %c0_i32_16 : i32
    scf.if %32 {
      %c0_17 = arith.constant 0 : index
      %c0_18 = arith.constant 0 : index
      %33 = vector.load %arg8[%c0_17, %c0_18] : memref<1x128xf32, #tpu.memory_space<vmem>>, vector<1x128xf32>
      %cst_19 = arith.constant 0.000000e+00 : f32
      %cst_20 = arith.constant 1.000000e+00 : f32
      %34 = vector.broadcast %cst_19 : f32 to vector<1x128xf32>
      %35 = arith.maximumf %34, %33 : vector<1x128xf32>
      %36 = vector.broadcast %cst_20 : f32 to vector<1x128xf32>
      %37 = arith.minimumf %36, %35 : vector<1x128xf32>
      %c0_21 = arith.constant 0 : index
      %c0_22 = arith.constant 0 : index
      %38 = vector.load %arg8[%c0_21, %c0_22] : memref<1x128xf32, #tpu.memory_space<vmem>>, vector<1x128xf32>
      tpu.vector_store %arg8[%c0_21, %c0_22], %37 {strides = array<i32>} : memref<1x128xf32, #tpu.memory_space<vmem>>, vector<1x128xf32>,
    } else {
    }
    return
  }
  func.func @transform_0(%arg0: i32, %arg1: i32, %arg2: memref<4xi32, #tpu.memory_space<smem>>) -> (i32, i32) {
    %0 = arith.index_cast %arg1 : i32 to index
    %1 = memref.load %arg2[%0] : memref<4xi32, #tpu.memory_space<smem>>
    %c0_i32 = arith.constant 0 : i32
    return %1, %arg0 : i32, i32
  }
  func.func @transform_1(%arg0: i32, %arg1: i32, %arg2: memref<4xi32, #tpu.memory_space<smem>>) -> (i32, i32) {
    %0 = arith.index_cast %arg1 : i32 to index
    %1 = memref.load %arg2[%0] : memref<4xi32, #tpu.memory_space<smem>>
    %c0_i32 = arith.constant 0 : i32
    %c0_i32_0 = arith.constant 0 : i32
    return %1, %c0_i32 : i32, i32
  }
  func.func @transform_2(%arg0: i32, %arg1: i32, %arg2: memref<4xi32, #tpu.memory_space<smem>>) -> (i32, i32) {
    %0 = arith.index_cast %arg1 : i32 to index
    %1 = memref.load %arg2[%0] : memref<4xi32, #tpu.memory_space<smem>>
    %c0_i32 = arith.constant 0 : i32
    %c0_i32_0 = arith.constant 0 : i32
    return %1, %c0_i32 : i32, i32
  }
  func.func @transform_3(%arg0: i32, %arg1: i32, %arg2: memref<4xi32, #tpu.memory_space<smem>>) -> (i32, i32) {
    %c0_i32 = arith.constant 0 : i32
    %c0_i32_0 = arith.constant 0 : i32
    return %c0_i32, %arg0 : i32, i32
  }
  func.func @transform_4(%arg0: i32, %arg1: i32, %arg2: memref<4xi32, #tpu.memory_space<smem>>) -> (i32, i32) {
    %0 = arith.index_cast %arg1 : i32 to index
    %1 = memref.load %arg2[%0] : memref<4xi32, #tpu.memory_space<smem>>
    %c0_i32 = arith.constant 0 : i32
    return %1, %arg0 : i32, i32
  }
  func.func @transform_5(%arg0: i32, %arg1: i32, %arg2: memref<4xi32, #tpu.memory_space<smem>>) -> (i32, i32) {
    %c0_i32 = arith.constant 0 : i32
    %c0_i32_0 = arith.constant 0 : i32
    return %c0_i32, %arg0 : i32, i32
  }
}

</mosaic_0001>

<bundles_post_ra>
// kernel: forward.1
= control target key start
LH: loop header
LB: loop body
LE: loop exit
PB: predicated region body
PF: predicated region fallthrough
CT: control target
= control target key end

     0   :  { %s1058_s0 = inlined_call_operand.vmem [shape: s32[4], index: 0, kind: input, shape index: {}]   ;;  %s1059_s1 = inlined_call_operand.vmem [shape: f32[320,128], index: 1, kind: input, shape index: {}, may-alias: {1,5}]   ;;  %s1060_s2 = inlined_call_operand.vmem [shape: f32[320,1], index: 2, kind: input, shape index: {}]   ;;  %s1061_s3 = inlined_call_operand.vmem [shape: f32[320,1], index: 3, kind: input, shape index: {}]   ;;  %s1062_s4 = inlined_call_operand.vmem [shape: f32[1,128], index: 4, kind: input, shape index: {}]   ;;  %s1063_s5 = inlined_call_operand.vmem [shape: f32[320,128], index: 5, kind: output, shape index: {0}, may-alias: {1,5}]   ;;  %s1064_s6 = inlined_call_operand.hbm [shape: f32[1,128], index: 6, kind: output, shape index: {1}]  }
   0x1   :  { %s12_s23 = sshll.u32 %s1058_s0, 4  ;;  %s13_s23 = int_to_ptr.vmem [resolvable:$true] %s12_s23 }
   0x2   :  { %s841_s24 = scalar_lea.vmem %s13_s23, 16  ;;  %p846_p1 = scmp.lt.s32.totalorder %s13_s23, %s13_s23 }
   0x3   :  { %p842_p0 = scmp.ne.s32.totalorder %s13_s23, %s841_s24  ;;  %p847_p2 = scmp.lt.s32.totalorder %s841_s24, %s841_s24 }
   0x5   :  { %p848_p3 = por %p847_p2, %p846_p1 }
   0x7   :  { %p849_p4 = pnand %p848_p3, %p842_p0 }
   0x9   :  { %852 = shalt.err (!%p849_p4)  }
   0xa   :  { %s907_s25 = smov [#allocation3]  }
   0xb   :  { %15 = dma.vmem_to_smem %s13_s23, 16, %s907_s25, [#allocation2] }
   0xc   :  { %889 = dma.done.wait [#allocation2], 16 }
   0xd   :  { %890 = vsyncadd [#allocation2], 4294967280 }
   0xe   :  { %17 = sfence }
   0xf   :  { %18 = vsyncpa [#allocation5], 0  ;;  %s949_s26 = smov 0   ;;  %s951_s27 = smov 0  }
  0x10   :  { %s953_s28 = smov 0  }
  0x11 LB: > { %s739_s0 = sadd.s32 4294967295, %s905_s28   ;;  %s33_s29 = sadd.s32 1, %s901_s27  ;;  %s905_s28 = sphi %s953_s28, %s24_s28   ;;  %s901_s27 = sphi %s951_s27, %s1067_s27   ;;  %s897_s26 = sphi %s949_s26, %s1066_s26  }
  0x12   : > { %p34_p5 = scmp.ge.s32.totalorder %s33_s29, 4  ;;  %p744_p6 = scmp.ge.s32.totalorder %s905_s28, 1 }
  0x13   : > { %p262_p7 = scmp.lt.s32.totalorder %s905_s28, 5 }
  0x14   : > { %s1069_s29 = smov (%p34_p5, %s33_s29), 0 }
  0x15   : > { %p263_p8 = pnand %p744_p6, %p262_p7 }
  0x16   : > { %s332_s30 = sld [smem:[#allocation3 + %s897_s26]] (!%p263_p8)  ;;  %p762_p13 = scmp.ne.s32.totalorder (!%p263_p8), %s897_s26, 0 }
  0x17   : > { %266 = sbr.rel (%p263_p8) target bundleno = 256 (0x100), region = 36  ;;  %s324_s7 = sld [smem:[#allocation3 + %s897_s26]] (!%p263_p8) }
  0x18   : > { %s313_s18 = sld [smem:[#allocation3 + %s897_s26]] (!%p263_p8) }
  0x19   : > { %s343_s19 = sld [smem:[#allocation3 + %s897_s26]] (!%p263_p8) }
  0x1c   : > { %v908_v0 = vmov 0   ;;  %s749_s8 = sshll.u32 %s332_s30, 3  ;;  %v909_v7 = vmov 0.0   ;;  %v761_v54 = vld [vmem:[%s1062_s4] ss:$0 sm:$0xff] }
  0x1d   : > { %803 = vset.pattern.permute.xlu0 %v908_v0  ;;  %819 = vset.pattern.permute.xlu1 %v908_v0  ;;  %p334_p9 = scmp.lt.s32.totalorder %s749_s8, 39  ;;  %s747_s9 = sshll.u32 %s324_s7, 3 }
  0x1e   : > { %p326_p10 = scmp.lt.s32.totalorder %s747_s9, 39  ;;  %s745_s20 = sshll.u32 %s313_s18, 3 }
  0x1f   : > { %s1071_s8 = smov (!%p334_p9, %s749_s8), 39  ;;  %p315_p11 = scmp.lt.s32.totalorder %s745_s20, 39 }
  0x20   : > { %s1073_s9 = smov (!%p326_p10, %s747_s9), 39  ;;  %s750_s10 = sshll.u32 %s1071_s8, 3 }
  0x21   : > { %s975_s13 = scalar_lea.vmem %s1061_s3, %s750_s10  ;;  %s748_s14 = sshll.u32 %s1073_s9, 3 }
  0x22   : > { %v354_v1 = vld [vmem:[%s975_s13] sm:$0xff]  ;;  %v355_v2 = vld [vmem:[%s975_s13 + $0x8] sm:$0xff]  ;;  %s982_s17 = scalar_lea.vmem %s1060_s2, %s748_s14  ;;  %v356_v3 = vld [vmem:[%s975_s13 + $0x10] sm:$0xff]  ;;  %s751_s21 = sshll.u32 %s343_s19, 3 }
  0x23   : > { %vm362_vm0 = vcmp.eq.f32.partialorder %v354_v1, 1.0  ;;  %vm363_vm1 = vcmp.eq.f32.partialorder %v355_v2, 1.0  ;;  %v466_v4 = vld [vmem:[%s982_s17 + $0x8] sm:$0xff]  ;;  %v357_v5 = vld [vmem:[%s975_s13 + $0x18] sm:$0xff]  ;;  %vm364_vm2 = vcmp.eq.f32.partialorder %v356_v3, 1.0  ;;  %v358_v6 = vld [vmem:[%s975_s13 + $0x20] sm:$0xff] }
  0x24   : > { %v753_v8 = vsel %vm362_vm0, 1.0, %v909_v7  ;;  %v754_v9 = vsel %vm363_vm1, 1.0, %v909_v7  ;;  %v359_v10 = vld [vmem:[%s975_s13 + $0x28] sm:$0xff]  ;;  %v468_v11 = vld [vmem:[%s982_s17 + $0x18] sm:$0xff]  ;;  %vm365_vm3 = vcmp.eq.f32.partialorder %v357_v5, 1.0  ;;  %v755_v13 = vsel %vm364_vm2, 1.0, %v909_v7 }
  0x25   : > { %v804_v12 = vpack.i.bf16 %v754_v9, %v753_v8  ;;  %vm366_vm4 = vcmp.eq.f32.partialorder %v358_v6, 1.0  ;;  %v465_v14 = vld [vmem:[%s982_s17] sm:$0xff]  ;;  %825 = vrcp.f32 %v466_v4  ;;  %v756_v15 = vsel %vm365_vm3, 1.0, %v909_v7  ;;  %v471_v18 = vld [vmem:[%s982_s17 + $0x30] sm:$0xff]  ;;  %v470_v23 = vld [vmem:[%s982_s17 + $0x28] sm:$0xff]  ;;  %s1075_s20 = smov (!%p315_p11, %s745_s20), 39 }
  0x26   : > { %vm367_vm5 = vcmp.eq.f32.partialorder %v359_v10, 1.0  ;;  %v469_v16 = vld [vmem:[%s982_s17 + $0x20] sm:$0xff]  ;;  %v809_v17 = vpack.i.bf16 %v756_v15, %v755_v13  ;;  %827 = vrcp.f32 %v468_v11  ;;  %v757_v19 = vsel %vm366_vm4, 1.0, %v909_v7  ;;  %v467_v21 = vld [vmem:[%s982_s17 + $0x10] sm:$0xff]  ;;  %v472_v26 = vld [vmem:[%s982_s17 + $0x38] sm:$0xff]  ;;  %p345_p12 = scmp.lt.s32.totalorder %s751_s21, 39 }
  0x27   : > { %805 = vperm.xlu0 %803, %v804_v12   ;;  %v758_v20 = vsel %vm367_vm5, 1.0, %v909_v7  ;;  %829 = vrcp.f32 %v465_v14  ;;  %vm476_vm6 = vcmp.ne.f32.partialorder %v468_v11, 0.0  ;;  %v360_v24 = vld [vmem:[%s975_s13 + $0x30] sm:$0xff]  ;;  %vm474_vm7 = vcmp.ne.f32.partialorder %v466_v4, 0.0  ;;  %v361_v39 = vld [vmem:[%s975_s13 + $0x38] sm:$0xff]  ;;  %s746_s22 = sshll.u32 %s1075_s20, 3 }
  0x28   : > { %831 = vrcp.f32 %v469_v16  ;;  %v814_v22 = vpack.i.bf16 %v758_v20, %v757_v19  ;;  %vm473_vm8 = vcmp.ne.f32.partialorder %v465_v14, 0.0  ;;  %vm477_vm9 = vcmp.ne.f32.partialorder %v469_v16, 0.0  ;;  %s1077_s21 = smov (!%p345_p12, %s751_s21), 39  ;;  %s321_s25 = scalar_lea.vmem %s1059_s1, %s746_s22 }
  0x29   : > { %833 = vrcp.f32 %v471_v18  ;;  %vm368_vm10 = vcmp.eq.f32.partialorder %v360_v24, 1.0  ;;  %vm479_vm11 = vcmp.ne.f32.partialorder %v471_v18, 0.0  ;;  %vm475_vm12 = vcmp.ne.f32.partialorder %v467_v21, 0.0  ;;  %s752_s8 = sshll.u32 %s1077_s21, 3  ;;  %v386_v58 = vld [vmem:[%s321_s25] sm:$0xff]  ;;  %v387_v59 = vld [vmem:[%s321_s25 + $0x8] sm:$0xff] }
  0x2a   : > { %835 = vrcp.f32 %v467_v21  ;;  %v759_v41 = vsel %vm368_vm10, 1.0, %v909_v7  ;;  %vm369_vm13 = vcmp.eq.f32.partialorder %v361_v39, 1.0  ;;  %vm478_vm14 = vcmp.ne.f32.partialorder %v470_v23, 0.0  ;;  %v392_v63 = vld [vmem:[%s321_s25 + $0x30] sm:$0xff]  ;;  %s1019_s11 = scalar_lea.vmem %s1063_s5, %s752_s8  ;;  %v393_v0 = vld [vmem:[%s321_s25 + $0x38] sm:$0xff]  ;;  %v390_v6 = vld [vmem:[%s321_s25 + $0x20] sm:$0xff] }
  0x2b   : > { %810 = vperm.xlu0 %803, %v809_v17   ;;  %837 = vrcp.f32 %v470_v23  ;;  %v760_v46 = vsel %vm369_vm13, 1.0, %v909_v7  ;;  %vm480_vm15 = vcmp.ne.f32.partialorder %v472_v26, 0.0  ;;  %v389_v3 = vld [vmem:[%s321_s25 + $0x18] sm:$0xff]  ;;  %v388_v7 = vld [vmem:[%s321_s25 + $0x10] sm:$0xff] }
  0x2c   : > { %839 = vrcp.f32 %v472_v26  ;;  %v820_v48 = vpack.i.bf16 %v760_v46, %v759_v41 }
  0x2f   : > { %815 = vperm.xlu0 %803, %v814_v22  }
  0x32   : > { %v826_v25 = vpop.eup %825 }
  0x33   : > { %v828_v27 = vpop.eup %827  ;;  %v498_v31 = vsel %vm474_vm7, %v826_v25, 0.0 }
  0x34   : > { %v830_v28 = vpop.eup %829  ;;  %v500_v29 = vsel %vm476_vm6, %v828_v27, 0.0  ;;  %v506_v40 = vmul.f32 %v754_v9, %v498_v31 }
  0x35   : > { %v832_v30 = vpop.eup %831  ;;  %v508_v32 = vmul.f32 %v756_v15, %v500_v29  ;;  %v497_v33 = vsel %vm473_vm8, %v830_v28, 0.0 }
  0x36   : > { %v834_v34 = vpop.eup %833  ;;  %v505_v35 = vmul.f32 %v753_v8, %v497_v33  ;;  %v501_v36 = vsel %vm477_vm9, %v832_v30, 0.0  ;;  %v391_v8 = vld [vmem:[%s321_s25 + $0x28] sm:$0xff] }
  0x37   : > { %v836_v37 = vpop.eup %835  ;;  %530 = vperm.xlu0 %803, %v508_v32   ;;  %v509_v38 = vmul.f32 %v757_v19, %v501_v36  ;;  %v503_v42 = vsel %vm479_vm11, %v834_v34, 0.0 }
  0x38   : > { %515 = vperm.xlu1 %819, %v505_v35   ;;  %v499_v43 = vsel %vm475_vm12, %v836_v37, 0.0  ;;  %v511_v44 = vmul.f32 %v759_v41, %v503_v42  ;;  %v838_v47 = vpop.eup %837 }
  0x39   : > { %v507_v45 = vmul.f32 %v755_v13, %v499_v43  ;;  %v502_v49 = vsel %vm478_vm14, %v838_v47, 0.0  ;;  %v840_v50 = vpop.eup %839 }
  0x3a   : > { %v510_v51 = vmul.f32 %v758_v20, %v502_v49  ;;  %v504_v52 = vsel %vm480_vm15, %v840_v50, 0.0 }
  0x3b   : > { %535 = vperm.xlu0 %803, %v509_v38   ;;  %v512_v53 = vmul.f32 %v760_v46, %v504_v52 }
  0x3c   : > { %520 = vperm.xlu1 %819, %v506_v40  }
  0x3f   : > { %545 = vperm.xlu0 %803, %v511_v44  }
  0x40   : > { %525 = vperm.xlu1 %819, %v507_v45  }
  0x44   : > { %821 = vperm.xlu1 %819, %v820_v48  }
  0x48   : > { %540 = vperm.xlu1 %819, %v510_v51  }
  0x4c   : > { %550 = vperm.xlu1 %819, %v512_v53  }
  0xa2   : > { %v806_v55 = vpop.permute.xlu0 %805 }
  0xa3   : > { %v808_v56 = vunpack.i.h.bf16 %v806_v55  ;;  %v807_v57 = vunpack.i.l.bf16 %v806_v55 }
  0xa5   : > { %v442_v60 = vmul.f32 %v808_v56, %v761_v54  ;;  %v441_v61 = vmul.f32 %v807_v57, %v761_v54 }
  0xa6   : > { %v811_v62 = vpop.permute.xlu0 %810 }
  0xa7   : > { %v813_v1 = vunpack.i.h.bf16 %v811_v62  ;;  %v812_v2 = vunpack.i.l.bf16 %v811_v62  ;;  %v449_v4 = vadd.f32 %v441_v61, %v386_v58  ;;  %v450_v5 = vadd.f32 %v442_v60, %v387_v59 }
  0xa9   : > { %v444_v9 = vmul.f32 %v813_v1, %v761_v54  ;;  %v443_v10 = vmul.f32 %v812_v2, %v761_v54  ;;  %457 = vst [vmem:[%s1019_s11] sm:$0xff] %v449_v4  ;;  %458 = vst [vmem:[%s1019_s11 + $0x8] sm:$0xff] %v450_v5 }
  0xaa   : > { %v816_v11 = vpop.permute.xlu0 %815 }
  0xab   : > { %v818_v12 = vunpack.i.h.bf16 %v816_v11  ;;  %v817_v13 = vunpack.i.l.bf16 %v816_v11  ;;  %v452_v14 = vadd.f32 %v444_v9, %v389_v3  ;;  %v451_v15 = vadd.f32 %v443_v10, %v388_v7 }
  0xad   : > { %v446_v16 = vmul.f32 %v818_v12, %v761_v54  ;;  %v445_v17 = vmul.f32 %v817_v13, %v761_v54  ;;  %459 = vst [vmem:[%s1019_s11 + $0x10] sm:$0xff] %v451_v15  ;;  %460 = vst [vmem:[%s1019_s11 + $0x18] sm:$0xff] %v452_v14 }
  0xaf   : > { %v453_v18 = vadd.f32 %v445_v17, %v390_v6  ;;  %v454_v19 = vadd.f32 %v446_v16, %v391_v8 }
  0xb1   : > { %461 = vst [vmem:[%s1019_s11 + $0x20] sm:$0xff] %v453_v18  ;;  %462 = vst [vmem:[%s1019_s11 + $0x28] sm:$0xff] %v454_v19 }
  0xb2   : > { %v531_v23 = vpop.permute.xlu0 %530 }
  0xb3   : > { %v516_v20 = vpop.permute.xlu1 %515  ;;  %v556_v28 = vmul.f32 %v531_v23, %v452_v14 }
  0xb4   : > { %v553_v24 = vmul.f32 %v516_v20, %v449_v4 }
  0xb6   : > { %v536_v30 = vpop.permute.xlu0 %535 }
  0xb7   : > { %v521_v21 = vpop.permute.xlu1 %520  ;;  %v557_v35 = vmul.f32 %v536_v30, %v453_v18 }
  0xb8   : > { %v554_v22 = vmul.f32 %v521_v21, %v450_v5 }
  0xba   : > { %v561_v26 = vadd.f32 %v554_v22, %v553_v24  ;;  %v546_v43 = vpop.permute.xlu0 %545 }
  0xbb   : > { %v526_v25 = vpop.permute.xlu1 %525 }
  0xbc   : > { %v555_v27 = vmul.f32 %v526_v25, %v451_v15 }
  0xbe   : > { %v562_v29 = vadd.f32 %v561_v26, %v555_v27 }
  0xbf   : > { %v822_v31 = vpop.permute.xlu1 %821 }
  0xc0   : > { %v563_v32 = vadd.f32 %v562_v29, %v556_v28  ;;  %v824_v33 = vunpack.i.h.bf16 %v822_v31  ;;  %v823_v34 = vunpack.i.l.bf16 %v822_v31 }
  0xc2   : > { %v448_v36 = vmul.f32 %v824_v33, %v761_v54  ;;  %v447_v37 = vmul.f32 %v823_v34, %v761_v54  ;;  %v564_v41 = vadd.f32 %v563_v32, %v557_v35 }
  0xc3   : > { %v541_v38 = vpop.permute.xlu1 %540 }
  0xc4   : > { %v455_v39 = vadd.f32 %v447_v37, %v392_v63  ;;  %v558_v40 = vmul.f32 %v541_v38, %v454_v19  ;;  %v456_v42 = vadd.f32 %v448_v36, %v393_v0 }
  0xc6   : > { %v565_v44 = vadd.f32 %v564_v41, %v558_v40  ;;  %463 = vst [vmem:[%s1019_s11 + $0x30] sm:$0xff] %v455_v39  ;;  %464 = vst [vmem:[%s1019_s11 + $0x38] sm:$0xff] %v456_v42  ;;  %v559_v45 = vmul.f32 %v546_v43, %v455_v39 }
  0xc7   : > { %v551_v46 = vpop.permute.xlu1 %550 }
  0xc8   : > { %v560_v47 = vmul.f32 %v551_v46, %v456_v42  ;;  %v566_v48 = vadd.f32 %v565_v44, %v559_v45 }
  0xca   : > { %v567_v49 = vadd.f32 %v566_v48, %v560_v47 }
  0xcc   : > { %v568_v50 = vrot.slane %v567_v49, 4 }
  0xce   : > { %v569_v51 = vadd.f32 %v568_v50, %v567_v49 }
  0xd0   : > { %v570_v52 = vrot.slane %v569_v51, 2 }
  0xd2   : > { %v571_v53 = vadd.f32 %v570_v52, %v569_v51  ;;  %577 = sbr.rel (%p762_p13) target bundleno = 217 (0xd9), region = 40 }
  0xd4   : > { %v572_v55 = vrot.slane %v571_v53, 1 }
  0xd6   : > { %v573_v54 = vadd.f32 %v572_v55, %v571_v53 }
  0xd8   : > { %578 = vst [vmem:[#allocation4] sm:$0x1] %v573_v54 }
  0xd9 PF: > { %p763_p0 = scmp.eq.s32.totalorder %s897_s26, 0 }
  0xdb   : > { %582 = sbr.rel (%p763_p0) target bundleno = 228 (0xe4), region = 44 }
  0xe0   : > { %v583_v56 = vld [vmem:[#allocation4] sm:$0x1] }
  0xe1   : > { %v584_v57 = vadd.f32 %v583_v56, %v573_v54 }
  0xe3   : > { %585 = vst [vmem:[#allocation4] sm:$0x1] %v584_v57 }
  0xe4 PF: > { %p764_p1 = scmp.ne.s32.totalorder %s897_s26, 3 }
  0xe6   : > { %589 = sbr.rel (%p764_p1) target bundleno = 241 (0xf1), region = 48 }
  0xeb   : > { %v590_v58 = vld [vmem:[#allocation4] sm:$0x1] }
  0xec   : > { %v591_v59 = vmax.f32 %v590_v58, 0.0 }
  0xee   : > { %v592_v60 = vmin.f32 %v591_v59, 1.0 }
  0xf0   : > { %593 = vst [vmem:[#allocation4] sm:$0x1] %v592_v60 }
  0xf1 PF: > { %p1034_p2 = scmp.eq.s32.totalorder %s739_s0, 3  ;;  %s910_s13 = smov [#allocation4]  }
  0xf2   : > { %s617_s14 = sshll.u32 %s910_s13, 4  ;;  %s618_s14 = int_to_ptr.vmem [resolvable:$true] %s617_s14 }
  0xf3   : > { %s853_s15 = scalar_lea.vmem %s618_s14, 16  ;;  %s859_s26 = scalar_lea.vmem %s618_s14, 32 }
  0xf4   : > { %p854_p3 = scmp.ne.s32.totalorder %s618_s14, %s853_s15  ;;  %p860_p6 = scmp.lt.s32.totalorder %s618_s14, %s618_s14 }
  0xf5   : > { %p861_p7 = scmp.lt.s32.totalorder %s859_s26, %s853_s15 }
  0xf6   : > { %p855_p4 = pnand %p854_p3, %p1034_p2 }
  0xf7   : > { %p862_p8 = por %p861_p7, %p860_p6 }
  0xf8   : > { %p856_p5 = pneg %p855_p4 }
  0xfa   : > { %p863_p9 = pnand %p862_p8, %p856_p5 }
  0xfc   : > { %866 = shalt.err (!%p863_p9)
}
  0xfd   : > { %770 = dma.vmem_to_hbm [thread:$0]  (%p1034_p2), %s618_s14, 16, %s1064_s6, [#allocation5]  }
  0xfe   : > { %892 = dma.done.wait (%p1034_p2), [#allocation5], 16  }
  0xff   : > { %894 = vsyncadd (%p1034_p2), [#allocation5], 4294967280 }
 0x100 PF: > { %s24_s28 = sadd.s32 1, %s905_s28   ;;  %s1066_s26 = smov %s901_s27 }
 0x101   : > { %p21_p10 = scmp.ge.s32.totalorder %s24_s28, 6   ;;  %s1067_s27 = smov %s1069_s29 }
 0x103   :  { %23 = sbr.rel (!%p21_p10) target bundleno = 17 (0x11), region = 97 }
 0x108   :  { %642 = vsyncpa [#allocation5], 1 }
 0x109   :  { %644 = vsyncpa [#allocation5 + $0x1], 1 }

</bundles_post_ra>
